<compile_context>
chip_gen: v7x
topology: tpu7x:2x2x1
jax: 0.10.0
libtpu: 0.0.40
codegen_flags: <defaults>
</compile_context>

<pallas_src>
import functools

import jax
import jax.numpy as jnp
from jax.experimental import pallas as pl
from jax.experimental.pallas import tpu as pltpu

LN_EPS = 1e-5  # PyTorch nn.LayerNorm default
_LANE = 128
_SUBLANE = 8
_SCRATCH_HEADROOM = 6 * 1024 * 1024  # compiler-internal scratch / slack


def _round_up(n, m):
    return ((n + m - 1) // m) * m


def _pad_to(a, shape):
    pads = tuple((0, t - s) for s, t in zip(a.shape, shape))
    if all(p == (0, 0) for p in pads):
        return a
    return jnp.pad(a, pads)


def _vmem_limit_bytes():
    """Generation-aware scoped-VMEM target (~75% of physical per-core VMEM)."""
    cap = None
    try:
        info = pltpu.get_tpu_info()
        for attr in ("vmem_capacity_bytes", "vmem_bytes", "vmem_capacity"):
            v = getattr(info, attr, None)
            if v:
                cap = int(v)
                break
    except Exception:
        cap = None
    if cap is None:
        cap = 64 * 1024 * 1024  # conservative fallback (v7x physical VMEM)
    return (cap * 3) // 4


def _layernorm(x, gamma, beta, true_n):
    """Two-pass LayerNorm over the last axis.

    `x` may be lane-padded with exact zeros beyond `true_n`; the padded lanes'
    contribution to sum((x-mu)^2) is exactly (padded_n - true_n)*mu^2, which is
    subtracted analytically, so the statistics match the unpadded tensor.
    Padded gamma/beta are zero, so padded output lanes stay exactly zero.
    """
    padded_n = x.shape[-1]
    inv_n = jnp.float32(1.0 / true_n)
    mu = jnp.sum(x, axis=-1, keepdims=True) * inv_n
    xc = x - mu
    ss = jnp.sum(xc * xc, axis=-1, keepdims=True)
    if padded_n != true_n:
        ss = ss - jnp.float32(padded_n - true_n) * (mu * mu)
    var = jnp.maximum(ss * inv_n, 0.0)
    return xc * (jax.lax.rsqrt(var + LN_EPS) * gamma) + beta


def _bf16_dot(x, w_ref, b_ref):
    """bf16 MXU matmul with f32 accumulation and f32 bias add."""
    y = jnp.dot(x.astype(jnp.bfloat16), w_ref[...],
                preferred_element_type=jnp.float32)
    return y + b_ref[...]


def mlp_skipper_kernel(
    x_ref,
    ln0_g_ref, ln0_b_ref,
    w0a_ref, b0a_ref, w0b_ref, b0b_ref,
    ln1_g_ref, ln1_b_ref,
    w1_ref, b1_ref,
    ln2_g_ref, ln2_b_ref,
    w2_ref, b2_ref,
    out_ref,
    *, nail_size, hidden_size,
):
    x = x_ref[...].astype(jnp.float32)

    # --- LN0 + layers[0] = Linear -> ReLU -> Linear ---
    x = _layernorm(x, ln0_g_ref[...], ln0_b_ref[...], nail_size)
    h = jnp.maximum(_bf16_dot(x, w0a_ref, b0a_ref), 0.0)
    x = _bf16_dot(h, w0b_ref, b0b_ref)

    # --- LN1 + layers[1] = ReLU -> Linear, residual add ---
    x = _layernorm(x, ln1_g_ref[...], ln1_b_ref[...], hidden_size)
    x = x + _bf16_dot(jnp.maximum(x, 0.0), w1_ref, b1_ref)

    # --- LN2 + layers[2] = ReLU -> Linear ---
    x = _layernorm(x, ln2_g_ref[...], ln2_b_ref[...], hidden_size)
    x = _bf16_dot(jnp.maximum(x, 0.0), w2_ref, b2_ref)

    out_ref[...] = x.astype(out_ref.dtype)


def prepare_params(params):
    """Pad params to lane-dense shapes and cast weights to bf16, ONCE.

    Returns (padded_param_dict, dims_dict).  Padded lanes of gamma/beta/bias
    and padded weight rows/columns are zero, so padding never leaks into the
    unpadded output columns.
    """
    nail = params["w0a"].shape[0]
    hid = params["w0b"].shape[0]
    ham = params["w2"].shape[1]
    nail_p = _round_up(nail, _LANE)
    hid_p = _round_up(hid, _LANE)
    ham_p = _round_up(ham, _LANE)

    f32 = jnp.float32
    padded = {
        "ln0_g": _pad_to(params["ln0_g"].astype(f32), (1, nail_p)),
        "ln0_b": _pad_to(params["ln0_b"].astype(f32), (1, nail_p)),
        "ln1_g": _pad_to(params["ln1_g"].astype(f32), (1, hid_p)),
        "ln1_b": _pad_to(params["ln1_b"].astype(f32), (1, hid_p)),
        "ln2_g": _pad_to(params["ln2_g"].astype(f32), (1, hid_p)),
        "ln2_b": _pad_to(params["ln2_b"].astype(f32), (1, hid_p)),
        "w0a": _pad_to(params["w0a"], (nail_p, hid_p)).astype(jnp.bfloat16),
        "b0a": _pad_to(params["b0a"].astype(f32), (1, hid_p)),
        "w0b": _pad_to(params["w0b"], (hid_p, hid_p)).astype(jnp.bfloat16),
        "b0b": _pad_to(params["b0b"].astype(f32), (1, hid_p)),
        "w1": _pad_to(params["w1"], (hid_p, hid_p)).astype(jnp.bfloat16),
        "b1": _pad_to(params["b1"].astype(f32), (1, hid_p)),
        "w2": _pad_to(params["w2"], (hid_p, ham_p)).astype(jnp.bfloat16),
        "b2": _pad_to(params["b2"].astype(f32), (1, ham_p)),
    }
    padded = jax.tree_util.tree_map(jax.device_put, padded)
    dims = dict(nail=nail, hid=hid, ham=ham,
                nail_p=nail_p, hid_p=hid_p, ham_p=ham_p)
    return padded, dims


def _cap_block_m(block_m, nail_p, hid_p, ham_p, param_bytes, x_itemsize, budget):
    """Shrink the batch tile until its VMEM footprint fits the budget.

    Params count twice (Pallas double-buffers even constant-index inputs);
    in/out activation tiles count twice (pipeline double-buffering); plus the
    live f32 intermediates of the kernel body and scratch headroom.
    """
    resident = 2 * param_bytes + _SCRATCH_HEADROOM
    while block_m > _SUBLANE:
        io_bytes = 2 * block_m * (nail_p * x_itemsize + ham_p * 4)
        work_bytes = 6 * block_m * hid_p * 4
        if resident + io_bytes + work_bytes <= budget:
            break
        block_m //= 2
    return max(_round_up(block_m, _SUBLANE), _SUBLANE)


def mlp_skipper(x, padded_params, dims, *, block_m=512):
    """x: [B, nail_size] (f32 or bf16).  padded_params/dims: from prepare_params."""
    B = x.shape[0]
    nail, hid, ham = dims["nail"], dims["hid"], dims["ham"]
    nail_p, hid_p, ham_p = dims["nail_p"], dims["hid_p"], dims["ham_p"]

    p = padded_params
    param_args = (p["ln0_g"], p["ln0_b"], p["w0a"], p["b0a"], p["w0b"], p["b0b"],
                  p["ln1_g"], p["ln1_b"], p["w1"], p["b1"],
                  p["ln2_g"], p["ln2_b"], p["w2"], p["b2"])
    param_bytes = sum(int(a.size) * a.dtype.itemsize for a in param_args)

    vmem_limit = _vmem_limit_bytes()
    budget = max(vmem_limit - _SCRATCH_HEADROOM, 8 * 1024 * 1024)
    x_itemsize = jnp.dtype(x.dtype).itemsize

    # --- batch tile / grid selection ---
    rows = _round_up(max(B, 1), _SUBLANE)
    block_m = min(_round_up(block_m, _SUBLANE), rows)
    block_m = min(block_m,
                  _cap_block_m(block_m, nail_p, hid_p, ham_p,
                               param_bytes, x_itemsize, budget))
    grid_m = pl.cdiv(rows, block_m)
    if rows >= 2 * _SUBLANE:
        # Splittable batch: use >= 2 tiles and an even tile count so the
        # "parallel" grid axis balances across v7x's two TensorCores.
        grid_m = max(grid_m, 2)
        if grid_m % 2:
            grid_m += 1
    # Rebalance the tile to the grid so per-tile padding waste is < 8 rows.
    block_m = _round_up(-(-rows // grid_m), _SUBLANE)
    b_pad = grid_m * block_m

    x_p = _pad_to(x, (b_pad, nail_p))
    args = (x_p,) + param_args

    kern = functools.partial(mlp_skipper_kernel,
                             nail_size=nail, hidden_size=hid)
    out_shape = jax.ShapeDtypeStruct((b_pad, ham_p), jnp.float32)

    flops = 2 * b_pad * (nail_p * hid_p + 2 * hid_p * hid_p + hid_p * ham_p)
    cost = pl.CostEstimate(
        flops=int(flops),
        transcendentals=int(3 * b_pad),  # one rsqrt per row per LayerNorm
        bytes_accessed=int(b_pad * nail_p * x_itemsize
                           + b_pad * ham_p * 4 + param_bytes),
    )
    cparams = pltpu.CompilerParams(
        dimension_semantics=("parallel",),
        vmem_limit_bytes=int(vmem_limit),
    )

    if grid_m == 1:
        # Tiny-batch path: no grid -> no pipelined-loop prologue/epilogue.
        out_p = pl.pallas_call(
            kern,
            out_shape=out_shape,
            in_specs=[pl.BlockSpec(memory_space=pltpu.MemorySpace.VMEM)
                      for _ in args],
            out_specs=pl.BlockSpec(memory_space=pltpu.MemorySpace.VMEM),
            compiler_params=pltpu.CompilerParams(
                vmem_limit_bytes=int(vmem_limit)),
            cost_estimate=cost,
        )(*args)
    else:
        # Batch-tiled path: parallel grid over batch; weights / LN params are
        # pinned to block (0, 0) so they stay VMEM-resident across steps.
        in_specs = [pl.BlockSpec((block_m, nail_p), lambda i: (i, 0))]
        in_specs += [pl.BlockSpec(a.shape, lambda i: (0, 0))
                     for a in param_args]
        out_p = pl.pallas_call(
            kern,
            out_shape=out_shape,
            grid=(grid_m,),
            in_specs=in_specs,
            out_specs=pl.BlockSpec((block_m, ham_p), lambda i: (i, 0)),
            compiler_params=cparams,
            cost_estimate=cost,
        )(*args)

    return out_p[:B, :ham]


def init_params(key, nail_size, hidden_size, hammer_size):
    ks = jax.random.split(key, 8)
    scale = 0.05
    return {
        # LayerNorm affine params (PyTorch default init: gamma=1, beta=0),
        # kept 2D [1, dim] for clean VMEM broadcasting.
        "ln0_g": jnp.ones((1, nail_size), jnp.float32),
        "ln0_b": jnp.zeros((1, nail_size), jnp.float32),
        "ln1_g": jnp.ones((1, hidden_size), jnp.float32),
        "ln1_b": jnp.zeros((1, hidden_size), jnp.float32),
        "ln2_g": jnp.ones((1, hidden_size), jnp.float32),
        "ln2_b": jnp.zeros((1, hidden_size), jnp.float32),
        # Linear weights stored [in, out] (equivalent to PyTorch x @ W.T).
        "w0a": scale * jax.random.normal(ks[0], (nail_size, hidden_size), jnp.float32),
        "b0a": scale * jax.random.normal(ks[1], (1, hidden_size), jnp.float32),
        "w0b": scale * jax.random.normal(ks[2], (hidden_size, hidden_size), jnp.float32),
        "b0b": scale * jax.random.normal(ks[3], (1, hidden_size), jnp.float32),
        "w1": scale * jax.random.normal(ks[4], (hidden_size, hidden_size), jnp.float32),
        "b1": scale * jax.random.normal(ks[5], (1, hidden_size), jnp.float32),
        "w2": scale * jax.random.normal(ks[6], (hidden_size, hammer_size), jnp.float32),
        "b2": scale * jax.random.normal(ks[7], (1, hammer_size), jnp.float32),
    }


def mlp_skipper_ref(x, p):
    """Pure-JAX reference mirroring the kernel's numerics (bf16 dot, f32 LN)."""
    def ln(v, g, b):
        mu = jnp.mean(v, axis=-1, keepdims=True)
        var = jnp.mean((v - mu) ** 2, axis=-1, keepdims=True)
        return (v - mu) * jax.lax.rsqrt(var + LN_EPS) * g + b

    def lin(v, w, b):
        return jnp.dot(v.astype(jnp.bfloat16), w.astype(jnp.bfloat16),
                       preferred_element_type=jnp.float32) + b

    x = x.astype(jnp.float32)
    x = ln(x, p["ln0_g"], p["ln0_b"])
    x = lin(jnp.maximum(lin(x, p["w0a"], p["b0a"]), 0.0), p["w0b"], p["b0b"])
    x = ln(x, p["ln1_g"], p["ln1_b"])
    x = x + lin(jnp.maximum(x, 0.0), p["w1"], p["b1"])
    x = ln(x, p["ln2_g"], p["ln2_b"])
    return lin(jnp.maximum(x, 0.0), p["w2"], p["b2"])


if __name__ == "__main__":
    nail_size, hidden_size, hammer_size = 32, 64, 16

    key = jax.random.PRNGKey(0)
    kx1, kx2, kp = jax.random.split(key, 3)
    params = init_params(kp, nail_size, hidden_size, hammer_size)
    # Pad + bf16-cast the weights once, outside the forward hot path.
    padded_params, dims = prepare_params(params)

    # Tiny batch (8 rows) -> no-grid path.
    x_small = jax.random.normal(kx1, (8, nail_size), jnp.float32)
    out_small = jax.block_until_ready(mlp_skipper(x_small, padded_params, dims))
    ref_small = mlp_skipper_ref(x_small, params)
    assert out_small.shape == (8, hammer_size)
    assert jnp.allclose(out_small, ref_small, atol=1e-2, rtol=1e-2), \
        "small-batch mismatch vs reference"

    # Larger batch (not a multiple of the tile) -> even parallel grid,
    # rebalanced tile (640 rows / 4 tiles of 160 -> zero padding waste).
    x_large = jax.random.normal(kx2, (640, nail_size), jnp.float32)
    out_large = jax.block_until_ready(
        mlp_skipper(x_large, padded_params, dims, block_m=256))
    ref_large = mlp_skipper_ref(x_large, params)
    assert out_large.shape == (640, hammer_size)
    assert jnp.allclose(out_large, ref_large, atol=1e-2, rtol=1e-2), \
        "tiled-batch mismatch vs reference"

    print("KERNEL_OK")
</pallas_src>

<mosaic_0001>
module attributes {stable_mosaic.version = 11 : i64} {
  func.func @mlp_skipper_kernel(%arg0: memref<8x128xf32, #tpu.memory_space<vmem>>, %arg1: memref<1x128xf32, #tpu.memory_space<vmem>>, %arg2: memref<1x128xf32, #tpu.memory_space<vmem>>, %arg3: memref<128x128xbf16, #tpu.memory_space<vmem>>, %arg4: memref<1x128xf32, #tpu.memory_space<vmem>>, %arg5: memref<128x128xbf16, #tpu.memory_space<vmem>>, %arg6: memref<1x128xf32, #tpu.memory_space<vmem>>, %arg7: memref<1x128xf32, #tpu.memory_space<vmem>>, %arg8: memref<1x128xf32, #tpu.memory_space<vmem>>, %arg9: memref<128x128xbf16, #tpu.memory_space<vmem>>, %arg10: memref<1x128xf32, #tpu.memory_space<vmem>>, %arg11: memref<1x128xf32, #tpu.memory_space<vmem>>, %arg12: memref<1x128xf32, #tpu.memory_space<vmem>>, %arg13: memref<128x128xbf16, #tpu.memory_space<vmem>>, %arg14: memref<1x128xf32, #tpu.memory_space<vmem>>, %arg15: memref<8x128xf32, #tpu.memory_space<vmem>>) attributes {dimension_semantics = [], scalar_prefetch = 0 : i64, scratch_operands = 0 : i64, tpu.core_type = #tpu.core_type<tc>} {
    %c0 = arith.constant 0 : index
    %c0_0 = arith.constant 0 : index
    %0 = vector.load %arg0[%c0, %c0_0] : memref<8x128xf32, #tpu.memory_space<vmem>>, vector<8x128xf32>
    %c0_1 = arith.constant 0 : index
    %c0_2 = arith.constant 0 : index
    %1 = vector.load %arg1[%c0_1, %c0_2] : memref<1x128xf32, #tpu.memory_space<vmem>>, vector<1x128xf32>
    %c0_3 = arith.constant 0 : index
    %c0_4 = arith.constant 0 : index
    %2 = vector.load %arg2[%c0_3, %c0_4] : memref<1x128xf32, #tpu.memory_space<vmem>>, vector<1x128xf32>
    %cst = arith.constant dense<0.000000e+00> : vector<8xf32>
    %3 = vector.multi_reduction <add>, %0, %cst [1] : vector<8x128xf32> to vector<8xf32>
    %4 = vector.shape_cast %3 : vector<8xf32> to vector<8x1xf32>
    %cst_5 = arith.constant 3.125000e-02 : f32
    %5 = vector.broadcast %cst_5 : f32 to vector<8x1xf32>
    %6 = arith.mulf %4, %5 : vector<8x1xf32>
    %7 = vector.broadcast %6 : vector<8x1xf32> to vector<8x128xf32>
    %8 = arith.subf %0, %7 : vector<8x128xf32>
    %9 = arith.mulf %8, %8 : vector<8x128xf32>
    %cst_6 = arith.constant dense<0.000000e+00> : vector<8xf32>
    %10 = vector.multi_reduction <add>, %9, %cst_6 [1] : vector<8x128xf32> to vector<8xf32>
    %11 = vector.shape_cast %10 : vector<8xf32> to vector<8x1xf32>
    %12 = arith.mulf %6, %6 : vector<8x1xf32>
    %cst_7 = arith.constant 9.600000e+01 : f32
    %13 = vector.broadcast %cst_7 : f32 to vector<8x1xf32>
    %14 = arith.mulf %13, %12 : vector<8x1xf32>
    %15 = arith.subf %11, %14 : vector<8x1xf32>
    %cst_8 = arith.constant 3.125000e-02 : f32
    %16 = vector.broadcast %cst_8 : f32 to vector<8x1xf32>
    %17 = arith.mulf %15, %16 : vector<8x1xf32>
    %cst_9 = arith.constant 0.000000e+00 : f32
    %18 = vector.broadcast %cst_9 : f32 to vector<8x1xf32>
    %19 = arith.maximumf %17, %18 : vector<8x1xf32>
    %cst_10 = arith.constant 9.99999974E-6 : f32
    %20 = vector.broadcast %cst_10 : f32 to vector<8x1xf32>
    %21 = arith.addf %19, %20 : vector<8x1xf32>
    %22 = math.rsqrt %21 : vector<8x1xf32>
    %23 = vector.broadcast %22 : vector<8x1xf32> to vector<8x128xf32>
    %24 = vector.broadcast %1 : vector<1x128xf32> to vector<8x128xf32>
    %25 = arith.mulf %23, %24 : vector<8x128xf32>
    %26 = arith.mulf %8, %25 : vector<8x128xf32>
    %27 = vector.broadcast %2 : vector<1x128xf32> to vector<8x128xf32>
    %28 = arith.addf %26, %27 : vector<8x128xf32>
    %29 = arith.truncf %28 : vector<8x128xf32> to vector<8x128xbf16>
    %c0_11 = arith.constant 0 : index
    %c0_12 = arith.constant 0 : index
    %30 = vector.load %arg3[%c0_11, %c0_12] : memref<128x128xbf16, #tpu.memory_space<vmem>>, vector<128x128xbf16>
    %cst_13 = arith.constant dense<0.000000e+00> : vector<8x128xf32>
    %31 = tpu.matmul %29, %30, %cst_13 {dimension_numbers = #tpu.dot_dimension_numbers<[1], [0], [0], [1], [0, 0, 1, 1], [], []>} : vector<8x128xbf16>, vector<128x128xbf16>, vector<8x128xf32> -> vector<8x128xf32>
    %c0_14 = arith.constant 0 : index
    %c0_15 = arith.constant 0 : index
    %32 = vector.load %arg4[%c0_14, %c0_15] : memref<1x128xf32, #tpu.memory_space<vmem>>, vector<1x128xf32>
    %33 = vector.broadcast %32 : vector<1x128xf32> to vector<8x128xf32>
    %34 = arith.addf %31, %33 : vector<8x128xf32>
    %cst_16 = arith.constant 0.000000e+00 : f32
    %35 = vector.broadcast %cst_16 : f32 to vector<8x128xf32>
    %36 = arith.maximumf %34, %35 : vector<8x128xf32>
    %37 = arith.truncf %36 : vector<8x128xf32> to vector<8x128xbf16>
    %c0_17 = arith.constant 0 : index
    %c0_18 = arith.constant 0 : index
    %38 = vector.load %arg5[%c0_17, %c0_18] : memref<128x128xbf16, #tpu.memory_space<vmem>>, vector<128x128xbf16>
    %cst_19 = arith.constant dense<0.000000e+00> : vector<8x128xf32>
    %39 = tpu.matmul %37, %38, %cst_19 {dimension_numbers = #tpu.dot_dimension_numbers<[1], [0], [0], [1], [0, 0, 1, 1], [], []>} : vector<8x128xbf16>, vector<128x128xbf16>, vector<8x128xf32> -> vector<8x128xf32>
    %c0_20 = arith.constant 0 : index
    %c0_21 = arith.constant 0 : index
    %40 = vector.load %arg6[%c0_20, %c0_21] : memref<1x128xf32, #tpu.memory_space<vmem>>, vector<1x128xf32>
    %41 = vector.broadcast %40 : vector<1x128xf32> to vector<8x128xf32>
    %42 = arith.addf %39, %41 : vector<8x128xf32>
    %c0_22 = arith.constant 0 : index
    %c0_23 = arith.constant 0 : index
    %43 = vector.load %arg7[%c0_22, %c0_23] : memref<1x128xf32, #tpu.memory_space<vmem>>, vector<1x128xf32>
    %c0_24 = arith.constant 0 : index
    %c0_25 = arith.constant 0 : index
    %44 = vector.load %arg8[%c0_24, %c0_25] : memref<1x128xf32, #tpu.memory_space<vmem>>, vector<1x128xf32>
    %cst_26 = arith.constant dense<0.000000e+00> : vector<8xf32>
    %45 = vector.multi_reduction <add>, %42, %cst_26 [1] : vector<8x128xf32> to vector<8xf32>
    %46 = vector.shape_cast %45 : vector<8xf32> to vector<8x1xf32>
    %cst_27 = arith.constant 1.562500e-02 : f32
    %47 = vector.broadcast %cst_27 : f32 to vector<8x1xf32>
    %48 = arith.mulf %46, %47 : vector<8x1xf32>
    %49 = vector.broadcast %48 : vector<8x1xf32> to vector<8x128xf32>
    %50 = arith.subf %42, %49 : vector<8x128xf32>
    %51 = arith.mulf %50, %50 : vector<8x128xf32>
    %cst_28 = arith.constant dense<0.000000e+00> : vector<8xf32>
    %52 = vector.multi_reduction <add>, %51, %cst_28 [1] : vector<8x128xf32> to vector<8xf32>
    %53 = vector.shape_cast %52 : vector<8xf32> to vector<8x1xf32>
    %54 = arith.mulf %48, %48 : vector<8x1xf32>
    %cst_29 = arith.constant 6.400000e+01 : f32
    %55 = vector.broadcast %cst_29 : f32 to vector<8x1xf32>
    %56 = arith.mulf %55, %54 : vector<8x1xf32>
    %57 = arith.subf %53, %56 : vector<8x1xf32>
    %cst_30 = arith.constant 1.562500e-02 : f32
    %58 = vector.broadcast %cst_30 : f32 to vector<8x1xf32>
    %59 = arith.mulf %57, %58 : vector<8x1xf32>
    %cst_31 = arith.constant 0.000000e+00 : f32
    %60 = vector.broadcast %cst_31 : f32 to vector<8x1xf32>
    %61 = arith.maximumf %59, %60 : vector<8x1xf32>
    %cst_32 = arith.constant 9.99999974E-6 : f32
    %62 = vector.broadcast %cst_32 : f32 to vector<8x1xf32>
    %63 = arith.addf %61, %62 : vector<8x1xf32>
    %64 = math.rsqrt %63 : vector<8x1xf32>
    %65 = vector.broadcast %64 : vector<8x1xf32> to vector<8x128xf32>
    %66 = vector.broadcast %43 : vector<1x128xf32> to vector<8x128xf32>
    %67 = arith.mulf %65, %66 : vector<8x128xf32>
    %68 = arith.mulf %50, %67 : vector<8x128xf32>
    %69 = vector.broadcast %44 : vector<1x128xf32> to vector<8x128xf32>
    %70 = arith.addf %68, %69 : vector<8x128xf32>
    %cst_33 = arith.constant 0.000000e+00 : f32
    %71 = vector.broadcast %cst_33 : f32 to vector<8x128xf32>
    %72 = arith.maximumf %70, %71 : vector<8x128xf32>
    %73 = arith.truncf %72 : vector<8x128xf32> to vector<8x128xbf16>
    %c0_34 = arith.constant 0 : index
    %c0_35 = arith.constant 0 : index
    %74 = vector.load %arg9[%c0_34, %c0_35] : memref<128x128xbf16, #tpu.memory_space<vmem>>, vector<128x128xbf16>
    %cst_36 = arith.constant dense<0.000000e+00> : vector<8x128xf32>
    %75 = tpu.matmul %73, %74, %cst_36 {dimension_numbers = #tpu.dot_dimension_numbers<[1], [0], [0], [1], [0, 0, 1, 1], [], []>} : vector<8x128xbf16>, vector<128x128xbf16>, vector<8x128xf32> -> vector<8x128xf32>
    %c0_37 = arith.constant 0 : index
    %c0_38 = arith.constant 0 : index
    %76 = vector.load %arg10[%c0_37, %c0_38] : memref<1x128xf32, #tpu.memory_space<vmem>>, vector<1x128xf32>
    %77 = vector.broadcast %76 : vector<1x128xf32> to vector<8x128xf32>
    %78 = arith.addf %75, %77 : vector<8x128xf32>
    %79 = arith.addf %70, %78 : vector<8x128xf32>
    %c0_39 = arith.constant 0 : index
    %c0_40 = arith.constant 0 : index
    %80 = vector.load %arg11[%c0_39, %c0_40] : memref<1x128xf32, #tpu.memory_space<vmem>>, vector<1x128xf32>
    %c0_41 = arith.constant 0 : index
    %c0_42 = arith.constant 0 : index
    %81 = vector.load %arg12[%c0_41, %c0_42] : memref<1x128xf32, #tpu.memory_space<vmem>>, vector<1x128xf32>
    %cst_43 = arith.constant dense<0.000000e+00> : vector<8xf32>
    %82 = vector.multi_reduction <add>, %79, %cst_43 [1] : vector<8x128xf32> to vector<8xf32>
    %83 = vector.shape_cast %82 : vector<8xf32> to vector<8x1xf32>
    %cst_44 = arith.constant 1.562500e-02 : f32
    %84 = vector.broadcast %cst_44 : f32 to vector<8x1xf32>
    %85 = arith.mulf %83, %84 : vector<8x1xf32>
    %86 = vector.broadcast %85 : vector<8x1xf32> to vector<8x128xf32>
    %87 = arith.subf %79, %86 : vector<8x128xf32>
    %88 = arith.mulf %87, %87 : vector<8x128xf32>
    %cst_45 = arith.constant dense<0.000000e+00> : vector<8xf32>
    %89 = vector.multi_reduction <add>, %88, %cst_45 [1] : vector<8x128xf32> to vector<8xf32>
    %90 = vector.shape_cast %89 : vector<8xf32> to vector<8x1xf32>
    %91 = arith.mulf %85, %85 : vector<8x1xf32>
    %cst_46 = arith.constant 6.400000e+01 : f32
    %92 = vector.broadcast %cst_46 : f32 to vector<8x1xf32>
    %93 = arith.mulf %92, %91 : vector<8x1xf32>
    %94 = arith.subf %90, %93 : vector<8x1xf32>
    %cst_47 = arith.constant 1.562500e-02 : f32
    %95 = vector.broadcast %cst_47 : f32 to vector<8x1xf32>
    %96 = arith.mulf %94, %95 : vector<8x1xf32>
    %cst_48 = arith.constant 0.000000e+00 : f32
    %97 = vector.broadcast %cst_48 : f32 to vector<8x1xf32>
    %98 = arith.maximumf %96, %97 : vector<8x1xf32>
    %cst_49 = arith.constant 9.99999974E-6 : f32
    %99 = vector.broadcast %cst_49 : f32 to vector<8x1xf32>
    %100 = arith.addf %98, %99 : vector<8x1xf32>
    %101 = math.rsqrt %100 : vector<8x1xf32>
    %102 = vector.broadcast %101 : vector<8x1xf32> to vector<8x128xf32>
    %103 = vector.broadcast %80 : vector<1x128xf32> to vector<8x128xf32>
    %104 = arith.mulf %102, %103 : vector<8x128xf32>
    %105 = arith.mulf %87, %104 : vector<8x128xf32>
    %106 = vector.broadcast %81 : vector<1x128xf32> to vector<8x128xf32>
    %107 = arith.addf %105, %106 : vector<8x128xf32>
    %cst_50 = arith.constant 0.000000e+00 : f32
    %108 = vector.broadcast %cst_50 : f32 to vector<8x128xf32>
    %109 = arith.maximumf %107, %108 : vector<8x128xf32>
    %110 = arith.truncf %109 : vector<8x128xf32> to vector<8x128xbf16>
    %c0_51 = arith.constant 0 : index
    %c0_52 = arith.constant 0 : index
    %111 = vector.load %arg13[%c0_51, %c0_52] : memref<128x128xbf16, #tpu.memory_space<vmem>>, vector<128x128xbf16>
    %cst_53 = arith.constant dense<0.000000e+00> : vector<8x128xf32>
    %112 = tpu.matmul %110, %111, %cst_53 {dimension_numbers = #tpu.dot_dimension_numbers<[1], [0], [0], [1], [0, 0, 1, 1], [], []>} : vector<8x128xbf16>, vector<128x128xbf16>, vector<8x128xf32> -> vector<8x128xf32>
    %c0_54 = arith.constant 0 : index
    %c0_55 = arith.constant 0 : index
    %113 = vector.load %arg14[%c0_54, %c0_55] : memref<1x128xf32, #tpu.memory_space<vmem>>, vector<1x128xf32>
    %114 = vector.broadcast %113 : vector<1x128xf32> to vector<8x128xf32>
    %115 = arith.addf %112, %114 : vector<8x128xf32>
    %c0_56 = arith.constant 0 : index
    %c0_57 = arith.constant 0 : index
    %116 = vector.load %arg15[%c0_56, %c0_57] : memref<8x128xf32, #tpu.memory_space<vmem>>, vector<8x128xf32>
    tpu.vector_store %arg15[%c0_56, %c0_57], %115 {strides = array<i32>} : memref<8x128xf32, #tpu.memory_space<vmem>>, vector<8x128xf32>,
    return
  }
}

</mosaic_0001>

<bundles_post_ra>
// kernel: tpu_custom_call.1
= control target key start
LH: loop header
LB: loop body
LE: loop exit
PB: predicated region body
PF: predicated region fallthrough
CT: control target
= control target key end

     0   :  { %s1272_s0 = inlined_call_operand.hbm [shape: f32[8,128], index: 0, kind: input, shape index: {}]   ;;  %s1273_s1 = inlined_call_operand.vmem [shape: f32[1,128], index: 1, kind: input, shape index: {}]   ;;  %s1274_s2 = inlined_call_operand.vmem [shape: f32[1,128], index: 2, kind: input, shape index: {}]   ;;  %s1275_s3 = inlined_call_operand.hbm [shape: bf16[128,128], index: 3, kind: input, shape index: {}]   ;;  %s1276_s4 = inlined_call_operand.vmem [shape: f32[1,128], index: 4, kind: input, shape index: {}]   ;;  %s1277_s5 = inlined_call_operand.hbm [shape: bf16[128,128], index: 5, kind: input, shape index: {}]   ;;  %s1278_s6 = inlined_call_operand.vmem [shape: f32[1,128], index: 6, kind: input, shape index: {}]   ;;  %s1279_s7 = inlined_call_operand.vmem [shape: f32[1,128], index: 7, kind: input, shape index: {}]   ;;  %s1280_s8 = inlined_call_operand.vmem [shape: f32[1,128], index: 8, kind: input, shape index: {}]   ;;  %s1281_s9 = inlined_call_operand.hbm [shape: bf16[128,128], index: 9, kind: input, shape index: {}]   ;;  %s1282_s10 = inlined_call_operand.vmem [shape: f32[1,128], index: 10, kind: input, shape index: {}]   ;;  %s1283_s11 = inlined_call_operand.vmem [shape: f32[1,128], index: 11, kind: input, shape index: {}]   ;;  %s1284_s12 = inlined_call_operand.vmem [shape: f32[1,128], index: 12, kind: input, shape index: {}]   ;;  %s1285_s13 = inlined_call_operand.hbm [shape: bf16[128,128], index: 13, kind: input, shape index: {}]   ;;  %s1286_s14 = inlined_call_operand.vmem [shape: f32[1,128], index: 14, kind: input, shape index: {}]   ;;  %s1287_s15 = inlined_call_operand.hbm [shape: f32[8,128], index: 15, kind: output, shape index: {}]  }
   0x1   :  { %1289 = sst [smem:[#allocation16_spill]] %s1287_s15 }
   0x2   :  { %20 = vsyncpa [#allocation3], 0 }
   0x3   :  { %21 = vsyncpa [#allocation6], 0 }
   0x4   :  { %22 = vsyncpa [#allocation9], 0 }
   0x5   :  { %23 = vsyncpa [#allocation4], 0  ;;  %s1028_s18 = smov [#allocation5]   ;;  %s888_s22 = scalar_lea.hbm %s1275_s3, 1024 }
   0x6   :  { %s43_s19 = sshll.u32 %s1028_s18, 4  ;;  %p889_p0 = scmp.ne.s32.totalorder %s1275_s3, %s888_s22  ;;  %s44_s19 = int_to_ptr.vmem [resolvable:$true] %s43_s19 }
   0x7   :  { %p892_p1 = scmp.lt.u32.totalorder %s888_s22, %s1275_s3 }
   0x9   :  { %p894_p2 = pnand %p892_p1, %p889_p0 }
   0xb   :  { %897 = shalt.err (!%p894_p2)
}
   0xc   :  { %s898_s27 = scalar_lea.vmem %s44_s19, 1024  ;;  %p903_p4 = scmp.lt.s32.totalorder %s44_s19, %s44_s19 }
   0xd   :  { %p899_p3 = scmp.ne.s32.totalorder %s44_s19, %s898_s27  ;;  %p904_p5 = scmp.lt.s32.totalorder %s898_s27, %s898_s27 }
   0xf   :  { %p905_p6 = por %p904_p5, %p903_p4 }
  0x11   :  { %p906_p7 = pnand %p905_p6, %p899_p3 }
  0x13   :  { %909 = shalt.err (!%p906_p7)
}
  0x14   :  { %s1029_s28 = smov 64   ;;  %s1030_s29 = smov 4  }
  0x15   :  { %49 = dma.hbm_to_vmem [thread:$0]  %s1275_s3, 1024, %s44_s19, [#allocation6], %s1029_s28, %s1029_s28, %s1030_s29  }
  0x16   :  { %s1031_s17 = smov [#allocation8]   ;;  %s1032_s20 = smov [#allocation2]  }
  0x17   :  { %s75_s18 = sshll.u32 %s1031_s17, 4  ;;  %s30_s21 = sshll.u32 %s1032_s20, 4  ;;  %s76_s18 = int_to_ptr.vmem [resolvable:$true] %s75_s18  ;;  %s31_s21 = int_to_ptr.vmem [resolvable:$true] %s30_s21 }
  0x18   :  { %s910_s24 = scalar_lea.hbm %s1281_s9, 1024 }
  0x19   :  { %p911_p8 = scmp.ne.s32.totalorder %s1281_s9, %s910_s24  ;;  %p914_p9 = scmp.lt.u32.totalorder %s910_s24, %s1281_s9 }
  0x1b   :  { %p916_p10 = pnand %p914_p9, %p911_p8 }
  0x1d   :  { %919 = shalt.err (!%p916_p10)
}
  0x1e   :  { %s920_s3 = scalar_lea.vmem %s76_s18, 1024  ;;  %p925_p12 = scmp.lt.s32.totalorder %s76_s18, %s76_s18 }
  0x1f   :  { %p921_p11 = scmp.ne.s32.totalorder %s76_s18, %s920_s3  ;;  %p926_p13 = scmp.lt.s32.totalorder %s920_s3, %s920_s3 }
  0x21   :  { %p927_p0 = por %p926_p13, %p925_p12 }
  0x23   :  { %p928_p1 = pnand %p927_p0, %p921_p11 }
  0x25   :  { %931 = shalt.err (!%p928_p1)
}
  0x26   :  { %81 = dma.hbm_to_vmem [thread:$0]  %s1281_s9, 1024, %s76_s18, [#allocation9], %s1029_s28, %s1029_s28, %s1030_s29  }
  0x27   :  { %s932_s17 = scalar_lea.hbm %s1272_s0, 128 }
  0x28   :  { %p933_p2 = scmp.ne.s32.totalorder %s1272_s0, %s932_s17  ;;  %p936_p3 = scmp.lt.u32.totalorder %s932_s17, %s1272_s0 }
  0x2a   :  { %p938_p4 = pnand %p936_p3, %p933_p2 }
  0x2c   :  { %941 = shalt.err (!%p938_p4)
}
  0x2d   :  { %s942_s25 = scalar_lea.vmem %s31_s21, 128  ;;  %p947_p6 = scmp.lt.s32.totalorder %s31_s21, %s31_s21 }
  0x2e   :  { %p943_p5 = scmp.ne.s32.totalorder %s31_s21, %s942_s25  ;;  %p948_p7 = scmp.lt.s32.totalorder %s942_s25, %s942_s25 }
  0x30   :  { %p949_p8 = por %p948_p7, %p947_p6 }
  0x32   :  { %p950_p9 = pnand %p949_p8, %p943_p5 }
  0x34   :  { %953 = shalt.err (!%p950_p9)
}
  0x35   :  { %33 = dma.hbm_to_vmem [thread:$0]  %s1272_s0, 128, %s31_s21, [#allocation3]  }
  0x36   :  { %s1033_s26 = smov [#allocation7]   ;;  %s1034_s3 = smov [#allocation10]  }
  0x37   :  { %s57_s27 = sshll.u32 %s1033_s26, 4  ;;  %s93_s19 = sshll.u32 %s1034_s3, 4  ;;  %s58_s27 = int_to_ptr.vmem [resolvable:$true] %s57_s27  ;;  %s94_s19 = int_to_ptr.vmem [resolvable:$true] %s93_s19 }
  0x38   :  { %s954_s15 = scalar_lea.hbm %s1277_s5, 1024 }
  0x39   :  { %p955_p10 = scmp.ne.s32.totalorder %s1277_s5, %s954_s15  ;;  %p958_p11 = scmp.lt.u32.totalorder %s954_s15, %s1277_s5 }
  0x3b   :  { %p960_p12 = pnand %p958_p11, %p955_p10 }
  0x3d   :  { %963 = shalt.err (!%p960_p12)
}
  0x3e   :  { %s964_s0 = scalar_lea.vmem %s58_s27, 1024  ;;  %p969_p0 = scmp.lt.s32.totalorder %s58_s27, %s58_s27 }
  0x3f   :  { %p965_p13 = scmp.ne.s32.totalorder %s58_s27, %s964_s0  ;;  %p970_p1 = scmp.lt.s32.totalorder %s964_s0, %s964_s0 }
  0x41   :  { %p971_p2 = por %p970_p1, %p969_p0 }
  0x43   :  { %p972_p3 = pnand %p971_p2, %p965_p13 }
  0x45   :  { %975 = shalt.err (!%p972_p3)
}
  0x46   :  { %63 = dma.hbm_to_vmem [thread:$0]  %s1277_s5, 1024, %s58_s27, [#allocation6], %s1029_s28, %s1029_s28, %s1030_s29  }
  0x47   :  { %s976_s18 = scalar_lea.hbm %s1285_s13, 1024 }
  0x48   :  { %p977_p4 = scmp.ne.s32.totalorder %s1285_s13, %s976_s18  ;;  %p980_p5 = scmp.lt.u32.totalorder %s976_s18, %s1285_s13 }
  0x4a   :  { %p982_p6 = pnand %p980_p5, %p977_p4 }
  0x4c   :  { %985 = shalt.err (!%p982_p6)
}
  0x4d   :  { %s986_s15 = scalar_lea.vmem %s94_s19, 1024  ;;  %p991_p8 = scmp.lt.s32.totalorder %s94_s19, %s94_s19 }
  0x4e   :  { %p987_p7 = scmp.ne.s32.totalorder %s94_s19, %s986_s15  ;;  %p992_p9 = scmp.lt.s32.totalorder %s986_s15, %s986_s15 }
  0x50   :  { %p993_p10 = por %p992_p9, %p991_p8 }
  0x52   :  { %p994_p11 = pnand %p993_p10, %p987_p7 }
  0x54   :  { %997 = shalt.err (!%p994_p11)
}
  0x55   :  { %99 = dma.hbm_to_vmem [thread:$0]  %s1285_s13, 1024, %s94_s19, [#allocation9], %s1029_s28, %s1029_s28, %s1030_s29  }
  0x56   :  { %1020 = dma.done.wait [#allocation3], 128  }
  0x57   :  { %1021 = vsyncadd [#allocation3], 4294967168 }
  0x58   :  { %1022 = dma.done.wait [#allocation6], 2048  }
  0x59   :  { %1023 = vsyncadd [#allocation6], 4294965248 }
  0x5a   :  { %1024 = dma.done.wait [#allocation9], 2048  }
  0x5b   :  { %1025 = vsyncadd [#allocation9], 4294965248  ;;  %v118_v0 = vld [vmem:[#allocation2] sm:$0xff]  ;;  %v850_v1 = vld [vmem:[#allocation5] sm:$0xff]   ;;  %v1035_v2 = vmov 0.0   ;;  %vm1036_vm0 = vmmov 0  }
  0x5c   :  { %121 = vadd.xlane.f32.xlu0 %v118_v0  ;;  %760 = vmatprep.subr.bf16.mxu0 %v1035_v2  ;;  %v851_v7 = vld [vmem:[#allocation5 + $0x8] sm:$0xff]   ;;  %v852_v8 = vld [vmem:[#allocation5 + $0x10] sm:$0xff]   ;;  %v853_v9 = vld [vmem:[#allocation5 + $0x18] sm:$0xff]   ;;  %s1037_s18 = smov [#allocation11]  }
  0x5d   :  { %780 = vmatprep.subr.bf16.mxu1 %v1035_v2  ;;  %761 = vmatpush3.bf16.msra.mxu0 %v850_v1  ;;  %v854_v10 = vld [vmem:[#allocation5 + $0x20] sm:$0xff]   ;;  %v855_v11 = vld [vmem:[#allocation5 + $0x28] sm:$0xff]   ;;  %v856_v12 = vld [vmem:[#allocation5 + $0x30] sm:$0xff]   ;;  %s671_s26 = sshll.u32 %s1037_s18, 4  ;;  %s672_s26 = int_to_ptr.vmem [resolvable:$true] %s671_s26 }
  0x5e   :  { %762 = vmatprep.subr.bf16.mxu0 %v1035_v2  ;;  %776 = vmatprep.mubr.msk.bf16.mxu0 %vm1036_vm0, %v1035_v2  ;;  %v857_v13 = vld [vmem:[#allocation5 + $0x38] sm:$0xff]   ;;  %v858_v14 = vld [vmem:[#allocation7] sm:$0xff]   ;;  %v859_v15 = vld [vmem:[#allocation7 + $0x8] sm:$0xff]   ;;  %p1003_p13 = scmp.lt.s32.totalorder %s672_s26, %s672_s26 }
  0x5f   :  { %796 = vmatprep.mubr.msk.bf16.mxu1 %vm1036_vm0, %v1035_v2  ;;  %781 = vmatpush3.bf16.msra.mxu1 %v858_v14  ;;  %v860_v16 = vld [vmem:[#allocation7 + $0x10] sm:$0xff]   ;;  %v861_v17 = vld [vmem:[#allocation7 + $0x18] sm:$0xff]   ;;  %v862_v18 = vld [vmem:[#allocation7 + $0x20] sm:$0xff]  }
  0x60   :  { %782 = vmatprep.subr.bf16.mxu1 %v1035_v2  ;;  %v863_v19 = vld [vmem:[#allocation7 + $0x28] sm:$0xff]   ;;  %v682_v27 = vld [vmem:[%s1273_s1] ss:$0 sm:$0xff]  ;;  %v864_v34 = vld [vmem:[#allocation7 + $0x30] sm:$0xff]  }
  0x61   :  { %763 = vmatpush3.bf16.msra.mxu0 %v851_v7  ;;  %v683_v30 = vld [vmem:[%s1274_s2] ss:$0 sm:$0xff]  ;;  %v866_v50 = vld [vmem:[#allocation8] sm:$0xff]   ;;  %v867_v55 = vld [vmem:[#allocation8 + $0x8] sm:$0xff]  }
  0x62   :  { %764 = vmatprep.subr.bf16.mxu0 %v1035_v2  ;;  %v865_v35 = vld [vmem:[#allocation7 + $0x38] sm:$0xff]   ;;  %v868_v56 = vld [vmem:[#allocation8 + $0x10] sm:$0xff]   ;;  %v870_v58 = vld [vmem:[#allocation8 + $0x20] sm:$0xff]  }
  0x63   :  { %783 = vmatpush3.bf16.msra.mxu1 %v859_v15  ;;  %v684_v36 = vld [vmem:[%s1276_s4] ss:$0 sm:$0xff]  ;;  %v871_v59 = vld [vmem:[#allocation8 + $0x28] sm:$0xff]   ;;  %v872_v60 = vld [vmem:[#allocation8 + $0x30] sm:$0xff]  }
  0x64   :  { %784 = vmatprep.subr.bf16.mxu1 %v1035_v2  ;;  %v693_v44 = vld [vmem:[%s1278_s6] ss:$0 sm:$0xff] }
  0x65   :  { %765 = vmatpush3.bf16.msra.mxu0 %v852_v8  ;;  %v869_v57 = vld [vmem:[#allocation8 + $0x18] sm:$0xff]  }
  0x66   :  { %766 = vmatprep.subr.bf16.mxu0 %v1035_v2  ;;  %v873_v61 = vld [vmem:[#allocation8 + $0x38] sm:$0xff]  }
  0x67   :  { %785 = vmatpush3.bf16.msra.mxu1 %v860_v16  ;;  %v704_v14 = vld [vmem:[%s1282_s10] ss:$0 sm:$0xff] }
  0x68   :  { %786 = vmatprep.subr.bf16.mxu1 %v1035_v2 }
  0x69   :  { %767 = vmatpush3.bf16.msra.mxu0 %v853_v9  ;;  %v703_v9 = vld [vmem:[%s1280_s8] ss:$0 sm:$0xff] }
  0x6a   :  { %768 = vmatprep.subr.bf16.mxu0 %v1035_v2 }
  0x6b   :  { %787 = vmatpush3.bf16.msra.mxu1 %v861_v17 }
  0x6c   :  { %788 = vmatprep.subr.bf16.mxu1 %v1035_v2 }
  0x6d   :  { %769 = vmatpush3.bf16.msra.mxu0 %v854_v10 }
  0x6e   :  { %770 = vmatprep.subr.bf16.mxu0 %v1035_v2 }
  0x6f   :  { %789 = vmatpush3.bf16.msra.mxu1 %v862_v18 }
  0x70   :  { %790 = vmatprep.subr.bf16.mxu1 %v1035_v2 }
  0x71   :  { %771 = vmatpush3.bf16.msra.mxu0 %v855_v11 }
  0x72   :  { %772 = vmatprep.subr.bf16.mxu0 %v1035_v2 }
  0x73   :  { %791 = vmatpush3.bf16.msra.mxu1 %v863_v19 }
  0x74   :  { %792 = vmatprep.subr.bf16.mxu1 %v1035_v2 }
  0x75   :  { %773 = vmatpush3.bf16.msra.mxu0 %v856_v12 }
  0x76   :  { %774 = vmatprep.subr.bf16.mxu0 %v1035_v2 }
  0x77   :  { %793 = vmatpush3.bf16.msra.mxu1 %v864_v34 }
  0x78   :  { %794 = vmatprep.subr.bf16.mxu1 %v1035_v2 }
  0x79   :  { %775 = vmatpush3.bf16.msra.mxu0 %v857_v13 }
  0x7a   :  { %800 = vmatprep.subr.bf16.mxu0 %v1035_v2 }
  0x7b   :  { %795 = vmatpush3.bf16.msra.mxu1 %v865_v35 }
  0x7c   :  { %820 = vmatprep.subr.bf16.mxu1 %v1035_v2 }
  0xe9   :  { %v122_v3 = vpop.xlane.xlu0 %121 }
  0xea   :  { %v123_v4 = vmul.f32 0.03125, %v122_v3 }
  0xec   :  { %v124_v5 = vsub.f32 %v118_v0, %v123_v4  ;;  %v128_v20 = vmul.f32 %v123_v4, %v123_v4 }
  0xee   :  { %v125_v6 = vmul.f32 %v124_v5, %v124_v5  ;;  %v129_v21 = vmul.f32 96.0, %v128_v20 }
  0xf0   :  { %126 = vadd.xlane.f32.xlu0 %v125_v6  ;;  %v702_v6 = vld [vmem:[%s1279_s7] ss:$0 sm:$0xff] }
 0x17d   :  { %v127_v22 = vpop.xlane.xlu0 %126 }
 0x17e   :  { %v130_v23 = vsub.f32 %v127_v22, %v129_v21  ;;  %v874_v21 = vld [vmem:[#allocation10] sm:$0xff]  }
 0x180   :  { %v131_v24 = vmul.f32 0.03125, %v130_v23 }
 0x182   :  { %v132_v25 = vmax.f32 %v131_v24, 0.0 }
 0x184   :  { %v133_v26 = vadd.f32 1e-05, %v132_v25 }
 0x186   :  { %882 = vrsqrt.f32 %v133_v26  ;;  %v875_v26 = vld [vmem:[#allocation10 + $0x8] sm:$0xff]  }
 0x190   :  { %v883_v28 = vpop.eup %882 }
 0x191   :  { %v141_v29 = vmul.f32 %v883_v28, %v682_v27  ;;  %v876_v27 = vld [vmem:[#allocation10 + $0x10] sm:$0xff]   ;;  %v877_v28 = vld [vmem:[#allocation10 + $0x18] sm:$0xff]  }
 0x193   :  { %v142_v31 = vmul.f32 %v141_v29, %v124_v5  ;;  %v878_v29 = vld [vmem:[#allocation10 + $0x20] sm:$0xff]  }
 0x195   :  { %v149_v32 = vadd.f32 %v683_v30, %v142_v31  ;;  %v879_v30 = vld [vmem:[#allocation10 + $0x28] sm:$0xff]   ;;  %v880_v31 = vld [vmem:[#allocation10 + $0x30] sm:$0xff]  }
 0x197   :  { %v150_v33 = vpack.c.bf16 %v149_v32, %v149_v32  ;;  %v881_v32 = vld [vmem:[#allocation10 + $0x38] sm:$0xff]  }
 0x199   :  { %777 = vmatmul.mubr.bf16.vlgmr.msra.gmra.mrb[0].mxu0 %v150_v33 }
 0x19a   :  { %816 = vmatprep.mubr.msk.bf16.mxu0 %vm1036_vm0, %v1035_v2  ;;  %801 = vmatpush3.bf16.msra.mxu0 %v866_v50 }
 0x19b   :  { %802 = vmatprep.subr.bf16.mxu0 %v1035_v2 }
 0x19e   :  { %803 = vmatpush3.bf16.msra.mxu0 %v867_v55 }
 0x19f   :  { %804 = vmatprep.subr.bf16.mxu0 %v1035_v2 }
 0x1a2   :  { %805 = vmatpush3.bf16.msra.mxu0 %v868_v56 }
 0x1a3   :  { %806 = vmatprep.subr.bf16.mxu0 %v1035_v2 }
 0x1a6   :  { %807 = vmatpush3.bf16.msra.mxu0 %v869_v57 }
 0x1a7   :  { %808 = vmatprep.subr.bf16.mxu0 %v1035_v2 }
 0x1aa   :  { %809 = vmatpush3.bf16.msra.mxu0 %v870_v58 }
 0x1ab   :  { %810 = vmatprep.subr.bf16.mxu0 %v1035_v2 }
 0x1ae   :  { %811 = vmatpush3.bf16.msra.mxu0 %v871_v59 }
 0x1af   :  { %812 = vmatprep.subr.bf16.mxu0 %v1035_v2 }
 0x1b2   :  { %813 = vmatpush3.bf16.msra.mxu0 %v872_v60 }
 0x1b3   :  { %814 = vmatprep.subr.bf16.mxu0 %v1035_v2 }
 0x1b6   :  { %815 = vmatpush3.bf16.msra.mxu0 %v873_v61 }
 0x26c   :  { %v256_v37 = vpop.f32.mrb[0].mxu0 }
 0x26d   :  { %v257_v38 = vadd.f32 %v684_v36, %v256_v37  ;;  %v778_v39 = vpop.f32.mrb[1].mxu0 }
 0x26e   :  { %v259_v40 = vpop.f32.mrb[2].mxu0 }
 0x26f   :  { %v262_v41 = vmax.f32 %v257_v38, 0.0  ;;  %v779_v42 = vpop.f32.mrb[3].mxu0  ;;  %v713_v40 = vld [vmem:[%s1283_s11] ss:$0 sm:$0xff]  ;;  %s998_s11 = scalar_lea.vmem %s672_s26, 128 }
 0x270   :  { %p999_p12 = scmp.ne.s32.totalorder %s672_s26, %s998_s11  ;;  %p1004_p0 = scmp.lt.s32.totalorder %s998_s11, %s998_s11 }
 0x271   :  { %v263_v43 = vpack.c.bf16 %v262_v41, %v262_v41 }
 0x272   :  { %p1005_p1 = por %p1004_p0, %p1003_p13 }
 0x273   :  { %797 = vmatmul.mubr.bf16.vlgmr.msra.gmra.mrb[0].mxu1 %v263_v43  ;;  %v714_v43 = vld [vmem:[%s1284_s12] ss:$0 sm:$0xff] }
 0x274   :  { %836 = vmatprep.mubr.msk.bf16.mxu1 %vm1036_vm0, %v1035_v2  ;;  %821 = vmatpush3.bf16.msra.mxu1 %v874_v21  ;;  %p1006_p2 = pnand %p1005_p1, %p999_p12 }
 0x275   :  { %822 = vmatprep.subr.bf16.mxu1 %v1035_v2 }
 0x278   :  { %823 = vmatpush3.bf16.msra.mxu1 %v875_v26 }
 0x279   :  { %824 = vmatprep.subr.bf16.mxu1 %v1035_v2 }
 0x27c   :  { %825 = vmatpush3.bf16.msra.mxu1 %v876_v27 }
 0x27d   :  { %826 = vmatprep.subr.bf16.mxu1 %v1035_v2 }
 0x280   :  { %827 = vmatpush3.bf16.msra.mxu1 %v877_v28 }
 0x281   :  { %828 = vmatprep.subr.bf16.mxu1 %v1035_v2 }
 0x284   :  { %829 = vmatpush3.bf16.msra.mxu1 %v878_v29 }
 0x285   :  { %830 = vmatprep.subr.bf16.mxu1 %v1035_v2 }
 0x288   :  { %831 = vmatpush3.bf16.msra.mxu1 %v879_v30 }
 0x289   :  { %832 = vmatprep.subr.bf16.mxu1 %v1035_v2 }
 0x28c   :  { %833 = vmatpush3.bf16.msra.mxu1 %v880_v31 }
 0x28d   :  { %834 = vmatprep.subr.bf16.mxu1 %v1035_v2 }
 0x290   :  { %835 = vmatpush3.bf16.msra.mxu1 %v881_v32 }
 0x346   :  { %v369_v45 = vpop.f32.mrb[0].mxu1 }
 0x347   :  { %v370_v46 = vadd.f32 %v693_v44, %v369_v45  ;;  %v798_v47 = vpop.f32.mrb[1].mxu1 }
 0x348   :  { %v372_v48 = vpop.f32.mrb[2].mxu1  ;;  %v715_v47 = vld [vmem:[%s1286_s14] ss:$0 sm:$0xff] }
 0x349   :  { %377 = vadd.xlane.f32.xlu1 %v370_v46  ;;  %v799_v49 = vpop.f32.mrb[3].mxu1 }
 0x3d6   :  { %v378_v51 = vpop.xlane.xlu1 %377 }
 0x3d7   :  { %v379_v52 = vmul.f32 0.015625, %v378_v51 }
 0x3d9   :  { %v380_v53 = vsub.f32 %v370_v46, %v379_v52  ;;  %v384_v62 = vmul.f32 %v379_v52, %v379_v52 }
 0x3db   :  { %v381_v54 = vmul.f32 %v380_v53, %v380_v53  ;;  %v385_v63 = vmul.f32 64.0, %v384_v62 }
 0x3dd   :  { %382 = vadd.xlane.f32.xlu1 %v381_v54 }
 0x46a   :  { %v383_v0 = vpop.xlane.xlu1 %382 }
 0x46b   :  { %v386_v1 = vsub.f32 %v383_v0, %v385_v63 }
 0x46d   :  { %v387_v3 = vmul.f32 0.015625, %v386_v1 }
 0x46f   :  { %v388_v4 = vmax.f32 %v387_v3, 0.0 }
 0x471   :  { %v389_v5 = vadd.f32 1e-05, %v388_v4 }
 0x473   :  { %884 = vrsqrt.f32 %v389_v5 }
 0x47d   :  { %v885_v7 = vpop.eup %884 }
 0x47e   :  { %v397_v8 = vmul.f32 %v885_v7, %v702_v6 }
 0x480   :  { %v398_v10 = vmul.f32 %v397_v8, %v380_v53 }
 0x482   :  { %v405_v11 = vadd.f32 %v703_v9, %v398_v10 }
 0x484   :  { %v406_v12 = vmax.f32 %v405_v11, 0.0 }
 0x486   :  { %v407_v13 = vpack.c.bf16 %v406_v12, %v406_v12 }
 0x488   :  { %817 = vmatmul.mubr.bf16.vlgmr.msra.gmra.mrb[4].mxu0 %v407_v13 }
 0x55b   :  { %v513_v15 = vpop.f32.mrb[4].mxu0 }
 0x55c   :  { %v514_v16 = vadd.f32 %v704_v14, %v513_v15  ;;  %v818_v17 = vpop.f32.mrb[5].mxu0 }
 0x55d   :  { %v516_v18 = vpop.f32.mrb[6].mxu0 }
 0x55e   :  { %v819_v19 = vpop.f32.mrb[7].mxu0  ;;  %v519_v20 = vadd.f32 %v514_v16, %v405_v11 }
 0x560   :  { %522 = vadd.xlane.f32.xlu0 %v519_v20 }
 0x5ed   :  { %v523_v22 = vpop.xlane.xlu0 %522 }
 0x5ee   :  { %v524_v23 = vmul.f32 0.015625, %v523_v22 }
 0x5f0   :  { %v525_v24 = vsub.f32 %v519_v20, %v524_v23  ;;  %v529_v33 = vmul.f32 %v524_v23, %v524_v23 }
 0x5f2   :  { %v526_v25 = vmul.f32 %v525_v24, %v525_v24  ;;  %v530_v34 = vmul.f32 64.0, %v529_v33 }
 0x5f4   :  { %527 = vadd.xlane.f32.xlu1 %v526_v25 }
 0x681   :  { %v528_v35 = vpop.xlane.xlu1 %527 }
 0x682   :  { %v531_v36 = vsub.f32 %v528_v35, %v530_v34 }
 0x684   :  { %v532_v37 = vmul.f32 0.015625, %v531_v36 }
 0x686   :  { %v533_v38 = vmax.f32 %v532_v37, 0.0 }
 0x688   :  { %v534_v39 = vadd.f32 1e-05, %v533_v38 }
 0x68a   :  { %886 = vrsqrt.f32 %v534_v39 }
 0x694   :  { %v887_v41 = vpop.eup %886 }
 0x695   :  { %v542_v42 = vmul.f32 %v887_v41, %v713_v40 }
 0x697   :  { %v543_v2 = vmul.f32 %v542_v42, %v525_v24 }
 0x699   :  { %v550_v44 = vadd.f32 %v714_v43, %v543_v2 }
 0x69b   :  { %v551_v45 = vmax.f32 %v550_v44, 0.0 }
 0x69d   :  { %v552_v46 = vpack.c.bf16 %v551_v45, %v551_v45 }
 0x69f   :  { %837 = vmatmul.mubr.bf16.vlgmr.msra.gmra.mrb[4].mxu1 %v552_v46 }
 0x772   :  { %v658_v48 = vpop.f32.mrb[4].mxu1 }
 0x773   :  { %v659_v49 = vadd.f32 %v715_v47, %v658_v48  ;;  %v838_v50 = vpop.f32.mrb[5].mxu1 }
 0x774   :  { %v661_v51 = vpop.f32.mrb[6].mxu1 }
 0x775   :  { %664 = vst [vmem:[#allocation11] sm:$0xff] %v659_v49  ;;  %v839_v52 = vpop.f32.mrb[7].mxu1 }
 0x776   :  { %1009 = shalt.err (!%p1006_p2)
}
 0x777   :  { %s1290_s30 = sld [smem:[#allocation16_spill]] }
 0x77d   :  { %s1010_s14 = scalar_lea.hbm %s1290_s30, 128 }
 0x77e   :  { %p1011_p3 = scmp.ne.s32.totalorder %s1290_s30, %s1010_s14  ;;  %p1014_p4 = scmp.lt.u32.totalorder %s1010_s14, %s1290_s30 }
 0x780   :  { %p1016_p5 = pnand %p1014_p4, %p1011_p3 }
 0x782   :  { %1019 = shalt.err (!%p1016_p5)
}
 0x783   :  { %674 = dma.vmem_to_hbm [thread:$0]  %s672_s26, 128, %s1290_s30, [#allocation4]  }
 0x784   :  { %1026 = dma.done.wait [#allocation4], 128  }
 0x785   :  { %1027 = vsyncadd [#allocation4], 4294967168 }
 0x786   :  { %678 = vsyncpa [#allocation3], 1 }
 0x787   :  { %679 = vsyncpa [#allocation6], 1 }
 0x788   :  { %680 = vsyncpa [#allocation9], 1 }
 0x789   :  { %681 = vsyncpa [#allocation4], 1 }

</bundles_post_ra>
